<compile_context>
chip_gen: v7x
topology: tpu7x:2x2x1
jax: 0.10.0
libtpu: 0.0.40
codegen_flags: <defaults>
</compile_context>

<pallas_src>
import jax
import jax.numpy as jnp
from jax.experimental import pallas as pl
from jax.experimental.pallas import tpu as pltpu


_MIN_CHUNK_BYTES = 512 * 1024   # don't split DMAs below ~0.5 MiB per chunk
_MAX_DMA_CHUNKS = 4             # 2-4 concurrent DMAs are enough to saturate HBM


def _make_identity_dma_kernel(chunk_starts, chunk_sizes):
    """Build a kernel copying `x_hbm` -> `o_hbm` with one DMA per static chunk."""
    n_chunks = len(chunk_starts)

    def kernel(x_hbm, o_hbm, sems):
        copies = []
        # Issue every chunk before waiting so the DMA engines overlap the read
        # and write streams across chunks (start all -> wait all).
        for c in range(n_chunks):
            lo = chunk_starts[c]
            sz = chunk_sizes[c]
            cp = pltpu.make_async_copy(
                x_hbm.at[pl.ds(lo, sz)],
                o_hbm.at[pl.ds(lo, sz)],
                sems.at[c],
            )
            cp.start()
            copies.append(cp)
        for cp in copies:
            cp.wait()

    return kernel


def identity_forward(x: jnp.ndarray, *, materialize_copy: bool = True) -> jnp.ndarray:
    """Identity forward pass.

    materialize_copy=False: faithful (and free) PyTorch semantics -- the input
    array is returned as-is (pair with buffer donation at the jit boundary).
    materialize_copy=True: produce a fresh buffer via a Pallas HBM->HBM DMA copy.
    """
    if not materialize_copy:
        return x

    orig_shape = x.shape
    dtype = x.dtype
    total = int(x.size)
    if total == 0:
        return x  # nothing to copy

    itemsize = jnp.dtype(dtype).itemsize
    total_bytes = total * itemsize

    # Flatten to a chunkable view.  The DMA engine doesn't care about vreg lane
    # layout, but a (R, 128) view keeps per-chunk descriptors tidy when the
    # element count allows it; a flat 1-D view handles any other size.
    if total % 128 == 0:
        view = x.reshape(-1, 128)
        row_align = 8          # chunk boundaries on whole (8,128)-sized slabs
    else:
        view = x.reshape(-1)
        row_align = 1024       # chunk boundaries on 1024-element multiples
    leading = view.shape[0]

    # Static chunking along dim 0: up to _MAX_DMA_CHUNKS concurrent DMAs, each at
    # least ~_MIN_CHUNK_BYTES; the last chunk takes the remainder.
    n_chunks = int(min(_MAX_DMA_CHUNKS, max(1, total_bytes // _MIN_CHUNK_BYTES)))
    if n_chunks > 1:
        base = (leading // n_chunks) // row_align * row_align
        if base == 0:
            n_chunks = 1
    if n_chunks == 1:
        chunk_starts, chunk_sizes = (0,), (leading,)
    else:
        chunk_starts = tuple(c * base for c in range(n_chunks))
        chunk_sizes = tuple([base] * (n_chunks - 1) + [leading - base * (n_chunks - 1)])

    out = pl.pallas_call(
        _make_identity_dma_kernel(chunk_starts, chunk_sizes),
        out_shape=jax.ShapeDtypeStruct(view.shape, dtype),
        in_specs=[pl.BlockSpec(memory_space=pl.ANY)],
        out_specs=pl.BlockSpec(memory_space=pl.ANY),
        scratch_shapes=[pltpu.SemaphoreType.DMA((n_chunks,))],
    )(view)
    return out.reshape(orig_shape)


if __name__ == "__main__":
    key = jax.random.PRNGKey(0)
    k1, k2, k3 = jax.random.split(key, 3)

    # NCHW input consistent with the NormedConv context: batch=2, channels=4, 16x16.
    x = jax.random.normal(k1, (2, 4, 16, 16), dtype=jnp.float32)
    y = jax.block_until_ready(identity_forward(x))
    assert y.shape == x.shape and y.dtype == x.dtype
    assert bool(jnp.all(y == x))

    # 2 MiB input: exercises the multi-chunk overlapped-DMA path (4 concurrent DMAs).
    x_big = jax.random.normal(k2, (8, 16, 64, 64), dtype=jnp.float32)
    y_big = jax.block_until_ready(identity_forward(x_big))
    assert bool(jnp.all(y_big == x_big))

    # Odd element count (not a multiple of 128): flat 1-D single-DMA path
    # (no VMEM involved, so no OOM cliff regardless of size).
    x_odd = jax.random.normal(k3, (3, 5, 7), dtype=jnp.float32)
    y_odd = jax.block_until_ready(identity_forward(x_odd))
    assert y_odd.shape == x_odd.shape
    assert bool(jnp.all(y_odd == x_odd))

    # Faithful zero-cost Identity for callers that can donate / accept aliasing.
    assert identity_forward(x, materialize_copy=False) is x

    print("KERNEL_OK")
</pallas_src>

<mosaic_0001>
module attributes {stable_mosaic.version = 11 : i64} {
  func.func @kernel(%arg0: memref<16x128xf32, #tpu.memory_space<any>>, %arg1: memref<16x128xf32, #tpu.memory_space<any>>, %arg2: memref<1x!tpu.dma_semaphore, #tpu.memory_space<semaphore_mem>>) attributes {dimension_semantics = [], scalar_prefetch = 0 : i64, scratch_operands = 1 : i64, tpu.core_type = #tpu.core_type<tc>} {
    %c0_i32 = arith.constant 0 : i32
    %c0_i32_0 = arith.constant 0 : i32
    %c0_i32_1 = arith.constant 0 : i32
    %0 = tpu.memref_slice %arg0[%c0_i32_0, %c0_i32_1] : memref<16x128xf32, #tpu.memory_space<any>> -> memref<16x128xf32, #tpu.memory_space<any>>
    %c0_i32_2 = arith.constant 0 : i32
    %c0_i32_3 = arith.constant 0 : i32
    %1 = tpu.memref_slice %arg1[%c0_i32_2, %c0_i32_3] : memref<16x128xf32, #tpu.memory_space<any>> -> memref<16x128xf32, #tpu.memory_space<any>>
    %2 = tpu.memref_slice %arg2[%c0_i32] : memref<1x!tpu.dma_semaphore, #tpu.memory_space<semaphore_mem>> -> memref<1x!tpu.dma_semaphore, #tpu.memory_space<semaphore_mem>>
    %3 = tpu.memref_squeeze %2 : memref<1x!tpu.dma_semaphore, #tpu.memory_space<semaphore_mem>> -> memref<!tpu.dma_semaphore, #tpu.memory_space<semaphore_mem>>
    tpu.enqueue_dma source(%0 : memref<16x128xf32, #tpu.memory_space<any>>) target(%1 : memref<16x128xf32, #tpu.memory_space<any>>) target_semaphore(%3 : memref<!tpu.dma_semaphore, #tpu.memory_space<semaphore_mem>>)
    %c0_i32_4 = arith.constant 0 : i32
    %c0_i32_5 = arith.constant 0 : i32
    %c0_i32_6 = arith.constant 0 : i32
    %4 = tpu.memref_slice %arg0[%c0_i32_5, %c0_i32_6] : memref<16x128xf32, #tpu.memory_space<any>> -> memref<16x128xf32, #tpu.memory_space<any>>
    %c0_i32_7 = arith.constant 0 : i32
    %c0_i32_8 = arith.constant 0 : i32
    %5 = tpu.memref_slice %arg1[%c0_i32_7, %c0_i32_8] : memref<16x128xf32, #tpu.memory_space<any>> -> memref<16x128xf32, #tpu.memory_space<any>>
    %6 = tpu.memref_slice %arg2[%c0_i32_4] : memref<1x!tpu.dma_semaphore, #tpu.memory_space<semaphore_mem>> -> memref<1x!tpu.dma_semaphore, #tpu.memory_space<semaphore_mem>>
    %7 = tpu.memref_squeeze %6 : memref<1x!tpu.dma_semaphore, #tpu.memory_space<semaphore_mem>> -> memref<!tpu.dma_semaphore, #tpu.memory_space<semaphore_mem>>
    tpu.wait_dma2 semaphore(%7 : memref<!tpu.dma_semaphore, #tpu.memory_space<semaphore_mem>>) src(%4 : memref<16x128xf32, #tpu.memory_space<any>>) dst(%5 : memref<16x128xf32, #tpu.memory_space<any>>)
    return
  }
}

</mosaic_0001>

<bundles_post_ra>
// kernel: tpu_custom_call.1
= control target key start
LH: loop header
LB: loop body
LE: loop exit
PB: predicated region body
PF: predicated region fallthrough
CT: control target
= control target key end

     0   :  { %s34_s6 = smov [#allocation2]   ;;  %s35_s7 = smov [#allocation3]   ;;  %s53_s0 = inlined_call_operand.hbm [shape: f32[16,128], index: 0, kind: input, shape index: {}]   ;;  %s54_s1 = inlined_call_operand.hbm [shape: f32[16,128], index: 1, kind: output, shape index: {}]  }
   0x1   :  { %s36_s8 = smov 0  }
   0x2   :  { %18 = dma.general %s53_s0, 256, %s54_s1, %s34_s6, %s35_s7, [#allocation4], %s36_s8, 0  }
   0x3   :  { %32 = dma.done.wait [#allocation2], 256 }
   0x4   :  { %33 = vsyncadd [#allocation2], 4294967040 }
   0x5   :  { %22 = vsyncmov [#allocation2] }
   0x8   :  { %s23_s13 = vpop.sfrf %22 }
   0x9   :  { %p28_p0 = scmp.ne.s32.totalorder %s23_s13, 0 }
   0xb   :  { %27 = shalt.err (%p28_p0)  }

</bundles_post_ra>
